<compile_context>
chip_gen: v7x
topology: tpu7x:2x2x1
jax: 0.10.0
libtpu: 0.0.40
codegen_flags: <defaults>
</compile_context>

<pallas_src>
import jax
import jax.numpy as jnp
from jax.experimental import pallas as pl
from jax.experimental.pallas import tpu as pltpu

# --------------------------- model dimensions -------------------------------
INPUT_DIM = 8          # node feature dim
NODE_TYPE_NUM = 3
INITIAL_DIM = 8
LATENT_DIM = (16, 24, 32)
DENSE_DIM = LATENT_DIM[-1]
START_HIDDEN = 16
TAIL_HIDDEN = 24

# ---------------------- packed parameter slab layout -------------------------
# name -> (row_offset, padded_row_count).  Every row offset is a multiple of 8
# (sublane tile) and every in-kernel slice is the full 32-lane width; unused
# rows/columns are zero so the zero-padded pipeline is exact.
SLAB_COLS = 32
_OFF = {
    "w_in":  (0,   8),    # (8, 8)   real
    "b_in":  (8,   1),    # (1, 8)
    "w_g1":  (16,  32),   # (8, 16)
    "b_g1":  (48,  1),    # (1, 16)
    "w_g2":  (56,  32),   # (16, 24)
    "b_g2":  (88,  1),    # (1, 24)
    "w_g3":  (96,  32),   # (24, 32)
    "b_g3":  (128, 1),    # (1, 32)
    "w_s1":  (136, 32),   # (32, 16)
    "b_s1":  (168, 1),    # (1, 16)
    "w_s2r": (176, 1),    # (1, 16)  start_mlp2 weight as a row
    "b_s2":  (184, 1),    # (1, 1)
    "w_t1a": (192, 32),   # (32, 24) tail_mlp1 W[:D]  (cur_out)
    "w_t1b": (224, 32),   # (32, 24) tail_mlp1 W[D:]  (selected emb)
    "b_t1":  (256, 1),    # (1, 24)
    "w_t2r": (264, 1),    # (1, 24)  tail_mlp2 weight as a row
    "b_t2":  (272, 1),    # (1, 1)
}
SLAB_ROWS = 280


# ------------------------------ kernel helpers -------------------------------
def _relu6(x):
    return jnp.minimum(jnp.maximum(x, 0.0), 6.0)


# ------------------------------ fused kernel ---------------------------------
def policy_kernel(scalars_ref,            # SMEM (B, 2) int32: [ob_len, ob_len_first]
                  a_ref,                  # (N, N) f32 raw adjacency (this graph)
                  x_ref,                  # (N, INPUT_DIM) f32 node features
                  g_ref,                  # (N, 2) f32 Gumbel noise [start, tail]
                  slab_ref,               # (SLAB_ROWS, SLAB_COLS) f32 packed params
                  out_ref):               # (N+1, 2) f32: rows 0..N-1 logits, row N actions
    N = a_ref.shape[0]
    b = pl.program_id(0)
    ob_len = scalars_ref[b, 0]
    ob_len_first = scalars_ref[b, 1]

    def w(name):                              # full-width, 8-aligned row slice
        r, nr = _OFF[name]
        return slab_ref[r:r + nr, :]

    def wscalar(name):                         # (1, 1) scalar bias
        r, _ = _OFF[name]
        return slab_ref[r:r + 1, 0:1]

    # ---- adjacency normalization: D^-1/2 A D^-1/2 with nan->0 semantics ----
    # torch normalize_adj uses column sums for both factors; the (N,1) factor
    # is taken from row sums here, which is identical because the adjacency
    # fed to the policy is symmetric (clip(a + a.T + I)).  No iota/diag build.
    A_raw = a_ref[...]
    deg_c = jnp.sum(A_raw, axis=0, keepdims=True)                 # (1, N)
    deg_r = jnp.sum(A_raw, axis=1, keepdims=True)                 # (N, 1)
    d_inv_c = jnp.where(deg_c > 0.0, jax.lax.rsqrt(deg_c), 0.0)
    d_inv_r = jnp.where(deg_r > 0.0, jax.lax.rsqrt(deg_r), 0.0)
    A = A_raw * d_inv_c * d_inv_r

    # ---- input MLP (no nonlinearity in the torch forward), width-32 padded ----
    h = jnp.dot(x_ref[...], w("w_in"), preferred_element_type=jnp.float32) + w("b_in")

    # ---- GCN stack ----
    # TODO(synk): GCN class body is not shown in the reference; assumed Kipf
    # propagation h = ReLU6((A @ h) @ W + b) matching the module's ReLU6 usage.
    for wn, bn in (("w_g1", "b_g1"), ("w_g2", "b_g2"), ("w_g3", "b_g3")):
        ah = jnp.dot(A, h, preferred_element_type=jnp.float32)
        h = _relu6(jnp.dot(ah, w(wn), preferred_element_type=jnp.float32) + w(bn))

    # ---- start head: Linear -> ReLU6 -> width-1 Linear as mul + lane-reduce ----
    s = _relu6(jnp.dot(h, w("w_s1"), preferred_element_type=jnp.float32) + w("b_s1"))
    start_logits = jnp.sum(s * w("w_s2r"), axis=1, keepdims=True) + wscalar("b_s2")  # (N,1)

    # ---- masked Gumbel-max categorical sampling of the start action ----
    idx = jax.lax.broadcasted_iota(jnp.int32, (N, 1), 0)
    NEG = jnp.float32(-1e30)
    big = jnp.int32(N)
    g = g_ref[...]                                                # (N, 2)

    start_scores = jnp.where(idx < ob_len_first, start_logits + g[:, 0:1], NEG)
    s_max = jnp.max(start_scores, axis=0, keepdims=True)          # (1, 1)
    start_idx = jnp.min(jnp.where(start_scores >= s_max, idx, big),
                        axis=0, keepdims=True)                    # (1, 1) int32

    # ---- tail head on cat([emb, emb[start].repeat], 1) via split matmul ----
    sel = jnp.sum(jnp.where(idx == start_idx, h, 0.0), axis=0, keepdims=True)  # (1, 32)
    t = _relu6(jnp.dot(h, w("w_t1a"), preferred_element_type=jnp.float32)
               + jnp.dot(sel, w("w_t1b"), preferred_element_type=jnp.float32)
               + w("b_t1"))
    tail_logits = jnp.sum(t * w("w_t2r"), axis=1, keepdims=True) + wscalar("b_t2")  # (N,1)

    tail_scores = jnp.where((idx < ob_len) & (idx != start_idx),
                            tail_logits + g[:, 1:2], NEG)
    t_max = jnp.max(tail_scores, axis=0, keepdims=True)
    tail_idx = jnp.min(jnp.where(tail_scores >= t_max, idx, big),
                       axis=0, keepdims=True)                     # (1, 1) int32

    # ---- single packed output block (logits rows + one action row) ----
    col2 = jax.lax.broadcasted_iota(jnp.int32, (N, 2), 1)
    out_ref[0:N, :] = jnp.where(col2 == 0, start_logits, tail_logits)
    lane2 = jax.lax.broadcasted_iota(jnp.int32, (1, 2), 1)
    out_ref[N:N + 1, :] = jnp.where(lane2 == 0,
                                    start_idx.astype(jnp.float32),
                                    tail_idx.astype(jnp.float32))


# ------------------------------ wrapper ---------------------------------------
@jax.jit
def policy_forward(node_feat, n2n_sp, node_num, slab, key):
    """Batched forward.

    node_feat: (B, N, INPUT_DIM) f32   n2n_sp: (B, N, N) f32
    node_num:  (B,) int32              slab:   (SLAB_ROWS, SLAB_COLS) f32
    Returns (start_action (B,), start_logits (B,N), tail_action (B,), tail_logits (B,N)).
    """
    B, N, _ = node_feat.shape
    node_num = jnp.asarray(node_num, jnp.int32).reshape(B)
    scalars = jnp.stack([node_num, node_num - NODE_TYPE_NUM], axis=1)      # (B, 2)
    gumbel = jax.random.gumbel(key, (B, N, 2), jnp.float32)                # one draw / batch

    grid_spec = pltpu.PrefetchScalarGridSpec(
        num_scalar_prefetch=1,
        grid=(B,),
        in_specs=[
            pl.BlockSpec((None, N, N), lambda b, s: (b, 0, 0)),
            pl.BlockSpec((None, N, INPUT_DIM), lambda b, s: (b, 0, 0)),
            pl.BlockSpec((None, N, 2), lambda b, s: (b, 0, 0)),
            pl.BlockSpec((SLAB_ROWS, SLAB_COLS), lambda b, s: (0, 0)),     # resident
        ],
        out_specs=pl.BlockSpec((None, N + 1, 2), lambda b, s: (b, 0, 0)),
    )
    out = pl.pallas_call(
        policy_kernel,
        grid_spec=grid_spec,
        out_shape=jax.ShapeDtypeStruct((B, N + 1, 2), jnp.float32),
        compiler_params=pltpu.CompilerParams(
            dimension_semantics=("parallel",)),   # batch axis -> both TCs on v7x
    )(scalars, n2n_sp, node_feat, gumbel, slab)

    logits = out[:, :N, :]
    actions = out[:, N, :].astype(jnp.int32)      # exact small ints round-trip through f32
    return actions[:, 0], logits[:, :, 0], actions[:, 1], logits[:, :, 1]


# ---------------------------- parameters --------------------------------------
def init_params(key):
    def linear(k, din, dout):
        kw, kb = jax.random.split(k)
        scale = 1.0 / jnp.sqrt(jnp.float32(din))
        w_ = jax.random.normal(kw, (din, dout), jnp.float32) * scale
        b_ = jax.random.normal(kb, (1, dout), jnp.float32) * 0.01
        return w_, b_

    keys = jax.random.split(key, 8)
    p = {}
    p["w_in"], p["b_in"] = linear(keys[0], INPUT_DIM, INITIAL_DIM)
    p["w_g1"], p["b_g1"] = linear(keys[1], INITIAL_DIM, LATENT_DIM[0])
    p["w_g2"], p["b_g2"] = linear(keys[2], LATENT_DIM[0], LATENT_DIM[1])
    p["w_g3"], p["b_g3"] = linear(keys[3], LATENT_DIM[1], LATENT_DIM[2])
    p["w_s1"], p["b_s1"] = linear(keys[4], DENSE_DIM, START_HIDDEN)
    p["w_s2"], p["b_s2"] = linear(keys[5], START_HIDDEN, 1)
    w_t1, p["b_t1"] = linear(keys[6], 2 * DENSE_DIM, TAIL_HIDDEN)
    p["w_t1a"] = w_t1[:DENSE_DIM]
    p["w_t1b"] = w_t1[DENSE_DIM:]
    p["w_t2"], p["b_t2"] = linear(keys[7], TAIL_HIDDEN, 1)
    return p


def pack_params(p):
    """Pack all weights/biases into one zero-padded f32 slab (one DMA total)."""
    entries = {
        "w_in": p["w_in"], "b_in": p["b_in"],
        "w_g1": p["w_g1"], "b_g1": p["b_g1"],
        "w_g2": p["w_g2"], "b_g2": p["b_g2"],
        "w_g3": p["w_g3"], "b_g3": p["b_g3"],
        "w_s1": p["w_s1"], "b_s1": p["b_s1"],
        "w_s2r": p["w_s2"].T, "b_s2": p["b_s2"],
        "w_t1a": p["w_t1a"], "w_t1b": p["w_t1b"], "b_t1": p["b_t1"],
        "w_t2r": p["w_t2"].T, "b_t2": p["b_t2"],
    }
    slab = jnp.zeros((SLAB_ROWS, SLAB_COLS), jnp.float32)
    for name, arr in entries.items():
        r, nr = _OFF[name]
        rr, cc = arr.shape
        assert rr <= nr and cc <= SLAB_COLS, (name, arr.shape)
        slab = slab.at[r:r + rr, 0:cc].set(arr)
    return slab


# --------------------------- pure-JAX reference --------------------------------
def reference_logits(node_feat, n2n_sp, p, start_action):
    deg = jnp.sum(n2n_sp, axis=0)
    d_inv = jnp.where(deg > 0, 1.0 / jnp.sqrt(deg), 0.0)
    A = n2n_sp * d_inv[None, :] * d_inv[:, None]
    h = node_feat @ p["w_in"] + p["b_in"]
    for wn, bn in (("w_g1", "b_g1"), ("w_g2", "b_g2"), ("w_g3", "b_g3")):
        h = jnp.clip((A @ h) @ p[wn] + p[bn], 0.0, 6.0)
    s = jnp.clip(h @ p["w_s1"] + p["b_s1"], 0.0, 6.0)
    start_logits = (s @ p["w_s2"] + p["b_s2"])[:, 0]
    sel = h[start_action][None, :]
    t = jnp.clip(h @ p["w_t1a"] + sel @ p["w_t1b"] + p["b_t1"], 0.0, 6.0)
    tail_logits = (t @ p["w_t2"] + p["b_t2"])[:, 0]
    return start_logits, tail_logits


# --------------------------------- main ----------------------------------------
if __name__ == "__main__":
    key = jax.random.PRNGKey(0)
    k_param, k_feat, k_adj, k_sample = jax.random.split(key, 4)

    B = 2                     # batched graphs (one per grid step)
    N = 12                    # max_node (total candidate rows)
    node_num = jnp.array([8, 10], jnp.int32)   # per-graph ob_len

    params = init_params(k_param)
    slab = pack_params(params)
    node_feat = jax.random.normal(k_feat, (B, N, INPUT_DIM), jnp.float32)
    # symmetric random adjacency with self loops
    a = (jax.random.uniform(k_adj, (B, N, N)) > 0.6).astype(jnp.float32)
    n2n_sp = jnp.clip(a + jnp.swapaxes(a, 1, 2) + jnp.eye(N, dtype=jnp.float32)[None],
                      0.0, 1.0)

    start_action, start_logits, tail_action, tail_logits = policy_forward(
        node_feat, n2n_sp, node_num, slab, k_sample)
    jax.block_until_ready((start_action, start_logits, tail_action, tail_logits))

    assert start_logits.shape == (B, N) and tail_logits.shape == (B, N)
    for g in range(B):
        ref_start, ref_tail = reference_logits(node_feat[g], n2n_sp[g], params,
                                               int(start_action[g]))
        # loose tolerance: MXU f32 pass differences
        assert jnp.allclose(start_logits[g], ref_start, atol=2e-2, rtol=2e-2)
        assert jnp.allclose(tail_logits[g], ref_tail, atol=2e-2, rtol=2e-2)
        ob_len = int(node_num[g])
        assert 0 <= int(start_action[g]) < ob_len - NODE_TYPE_NUM
        assert 0 <= int(tail_action[g]) < ob_len
        assert int(tail_action[g]) != int(start_action[g])
    print("KERNEL_OK")
</pallas_src>

<mosaic_0001>
module attributes {stable_mosaic.version = 11 : i64} {
  func.func @policy_kernel(%arg0: i32, %arg1: memref<2x2xi32, #tpu.memory_space<smem>>, %arg2: memref<1x12x12xf32, #tpu.memory_space<vmem>>, %arg3: memref<1x12x8xf32, #tpu.memory_space<vmem>>, %arg4: memref<1x12x2xf32, #tpu.memory_space<vmem>>, %arg5: memref<280x32xf32, #tpu.memory_space<vmem>>, %arg6: memref<1x13x2xf32, #tpu.memory_space<vmem>>) attributes {dimension_semantics = [#tpu.dimension_semantics<parallel>], iteration_bounds = array<i64: 2>, scalar_prefetch = 1 : i64, scratch_operands = 0 : i64, tpu.core_type = #tpu.core_type<tc>, window_params = [{transform_indices = @transform_0, window_bounds = array<i64: 1, 12, 12>}, {transform_indices = @transform_1, window_bounds = array<i64: 1, 12, 8>}, {transform_indices = @transform_2, window_bounds = array<i64: 1, 12, 2>}, {pipeline_mode = #tpu.pipeline_mode<synchronous>, transform_indices = @transform_3, window_bounds = array<i64: 280, 32>}, {transform_indices = @transform_4, window_bounds = array<i64: 1, 13, 2>}]} {
    %0 = arith.index_cast %arg0 : i32 to index
    %c0 = arith.constant 0 : index
    %1 = memref.load %arg1[%0, %c0] : memref<2x2xi32, #tpu.memory_space<smem>>
    %2 = arith.index_cast %arg0 : i32 to index
    %c1 = arith.constant 1 : index
    %3 = memref.load %arg1[%2, %c1] : memref<2x2xi32, #tpu.memory_space<smem>>
    %c0_0 = arith.constant 0 : index
    %c0_1 = arith.constant 0 : index
    %c0_2 = arith.constant 0 : index
    %4 = vector.load %arg2[%c0_0, %c0_1, %c0_2] : memref<1x12x12xf32, #tpu.memory_space<vmem>>, vector<1x12x12xf32>
    %5 = vector.shape_cast %4 : vector<1x12x12xf32> to vector<12x12xf32>
    %cst = arith.constant dense<0.000000e+00> : vector<12xf32>
    %6 = vector.multi_reduction <add>, %5, %cst [0] : vector<12x12xf32> to vector<12xf32>
    %7 = vector.shape_cast %6 : vector<12xf32> to vector<1x12xf32>
    %cst_3 = arith.constant dense<0.000000e+00> : vector<12xf32>
    %8 = vector.multi_reduction <add>, %5, %cst_3 [1] : vector<12x12xf32> to vector<12xf32>
    %9 = vector.shape_cast %8 : vector<12xf32> to vector<12x1xf32>
    %cst_4 = arith.constant 0.000000e+00 : f32
    %10 = vector.broadcast %cst_4 : f32 to vector<1x12xf32>
    %11 = arith.cmpf ogt, %7, %10 : vector<1x12xf32>
    %12 = math.rsqrt %7 : vector<1x12xf32>
    %cst_5 = arith.constant 0.000000e+00 : f32
    %13 = vector.broadcast %cst_5 : f32 to vector<1x12xf32>
    %14 = arith.select %11, %12, %13 : vector<1x12xi1>, vector<1x12xf32>
    %cst_6 = arith.constant 0.000000e+00 : f32
    %15 = vector.broadcast %cst_6 : f32 to vector<12x1xf32>
    %16 = arith.cmpf ogt, %9, %15 : vector<12x1xf32>
    %17 = math.rsqrt %9 : vector<12x1xf32>
    %cst_7 = arith.constant 0.000000e+00 : f32
    %18 = vector.broadcast %cst_7 : f32 to vector<12x1xf32>
    %19 = arith.select %16, %17, %18 : vector<12x1xi1>, vector<12x1xf32>
    %20 = vector.broadcast %14 : vector<1x12xf32> to vector<12x12xf32>
    %21 = arith.mulf %5, %20 : vector<12x12xf32>
    %22 = vector.broadcast %19 : vector<12x1xf32> to vector<12x12xf32>
    %23 = arith.mulf %21, %22 : vector<12x12xf32>
    %c0_8 = arith.constant 0 : index
    %c0_9 = arith.constant 0 : index
    %c0_10 = arith.constant 0 : index
    %24 = vector.load %arg3[%c0_8, %c0_9, %c0_10] : memref<1x12x8xf32, #tpu.memory_space<vmem>>, vector<1x12x8xf32>
    %25 = vector.shape_cast %24 : vector<1x12x8xf32> to vector<12x8xf32>
    %c0_11 = arith.constant 0 : index
    %c0_12 = arith.constant 0 : index
    %26 = vector.load %arg5[%c0_11, %c0_12] : memref<280x32xf32, #tpu.memory_space<vmem>>, vector<8x32xf32>
    %cst_13 = arith.constant dense<0.000000e+00> : vector<12x32xf32>
    %27 = tpu.matmul %25, %26, %cst_13 {dimension_numbers = #tpu.dot_dimension_numbers<[1], [0], [0], [1], [0, 0, 1, 1], [], []>} : vector<12x8xf32>, vector<8x32xf32>, vector<12x32xf32> -> vector<12x32xf32>
    %c8 = arith.constant 8 : index
    %c0_14 = arith.constant 0 : index
    %28 = vector.load %arg5[%c8, %c0_14] : memref<280x32xf32, #tpu.memory_space<vmem>>, vector<1x32xf32>
    %29 = vector.broadcast %28 : vector<1x32xf32> to vector<12x32xf32>
    %30 = arith.addf %27, %29 : vector<12x32xf32>
    %cst_15 = arith.constant dense<0.000000e+00> : vector<12x32xf32>
    %31 = tpu.matmul %23, %30, %cst_15 {dimension_numbers = #tpu.dot_dimension_numbers<[1], [0], [0], [1], [0, 0, 1, 1], [], []>} : vector<12x12xf32>, vector<12x32xf32>, vector<12x32xf32> -> vector<12x32xf32>
    %c16 = arith.constant 16 : index
    %c0_16 = arith.constant 0 : index
    %32 = vector.load %arg5[%c16, %c0_16] : memref<280x32xf32, #tpu.memory_space<vmem>>, vector<32x32xf32>
    %cst_17 = arith.constant dense<0.000000e+00> : vector<12x32xf32>
    %33 = tpu.matmul %31, %32, %cst_17 {dimension_numbers = #tpu.dot_dimension_numbers<[1], [0], [0], [1], [0, 0, 1, 1], [], []>} : vector<12x32xf32>, vector<32x32xf32>, vector<12x32xf32> -> vector<12x32xf32>
    %c48 = arith.constant 48 : index
    %c0_18 = arith.constant 0 : index
    %34 = vector.load %arg5[%c48, %c0_18] : memref<280x32xf32, #tpu.memory_space<vmem>>, vector<1x32xf32>
    %35 = vector.broadcast %34 : vector<1x32xf32> to vector<12x32xf32>
    %36 = arith.addf %33, %35 : vector<12x32xf32>
    %cst_19 = arith.constant 0.000000e+00 : f32
    %37 = vector.broadcast %cst_19 : f32 to vector<12x32xf32>
    %38 = arith.maximumf %36, %37 : vector<12x32xf32>
    %cst_20 = arith.constant 6.000000e+00 : f32
    %39 = vector.broadcast %cst_20 : f32 to vector<12x32xf32>
    %40 = arith.minimumf %38, %39 : vector<12x32xf32>
    %cst_21 = arith.constant dense<0.000000e+00> : vector<12x32xf32>
    %41 = tpu.matmul %23, %40, %cst_21 {dimension_numbers = #tpu.dot_dimension_numbers<[1], [0], [0], [1], [0, 0, 1, 1], [], []>} : vector<12x12xf32>, vector<12x32xf32>, vector<12x32xf32> -> vector<12x32xf32>
    %c56 = arith.constant 56 : index
    %c0_22 = arith.constant 0 : index
    %42 = vector.load %arg5[%c56, %c0_22] : memref<280x32xf32, #tpu.memory_space<vmem>>, vector<32x32xf32>
    %cst_23 = arith.constant dense<0.000000e+00> : vector<12x32xf32>
    %43 = tpu.matmul %41, %42, %cst_23 {dimension_numbers = #tpu.dot_dimension_numbers<[1], [0], [0], [1], [0, 0, 1, 1], [], []>} : vector<12x32xf32>, vector<32x32xf32>, vector<12x32xf32> -> vector<12x32xf32>
    %c88 = arith.constant 88 : index
    %c0_24 = arith.constant 0 : index
    %44 = vector.load %arg5[%c88, %c0_24] : memref<280x32xf32, #tpu.memory_space<vmem>>, vector<1x32xf32>
    %45 = vector.broadcast %44 : vector<1x32xf32> to vector<12x32xf32>
    %46 = arith.addf %43, %45 : vector<12x32xf32>
    %cst_25 = arith.constant 0.000000e+00 : f32
    %47 = vector.broadcast %cst_25 : f32 to vector<12x32xf32>
    %48 = arith.maximumf %46, %47 : vector<12x32xf32>
    %cst_26 = arith.constant 6.000000e+00 : f32
    %49 = vector.broadcast %cst_26 : f32 to vector<12x32xf32>
    %50 = arith.minimumf %48, %49 : vector<12x32xf32>
    %cst_27 = arith.constant dense<0.000000e+00> : vector<12x32xf32>
    %51 = tpu.matmul %23, %50, %cst_27 {dimension_numbers = #tpu.dot_dimension_numbers<[1], [0], [0], [1], [0, 0, 1, 1], [], []>} : vector<12x12xf32>, vector<12x32xf32>, vector<12x32xf32> -> vector<12x32xf32>
    %c96 = arith.constant 96 : index
    %c0_28 = arith.constant 0 : index
    %52 = vector.load %arg5[%c96, %c0_28] : memref<280x32xf32, #tpu.memory_space<vmem>>, vector<32x32xf32>
    %cst_29 = arith.constant dense<0.000000e+00> : vector<12x32xf32>
    %53 = tpu.matmul %51, %52, %cst_29 {dimension_numbers = #tpu.dot_dimension_numbers<[1], [0], [0], [1], [0, 0, 1, 1], [], []>} : vector<12x32xf32>, vector<32x32xf32>, vector<12x32xf32> -> vector<12x32xf32>
    %c128 = arith.constant 128 : index
    %c0_30 = arith.constant 0 : index
    %54 = vector.load %arg5[%c128, %c0_30] : memref<280x32xf32, #tpu.memory_space<vmem>>, vector<1x32xf32>
    %55 = vector.broadcast %54 : vector<1x32xf32> to vector<12x32xf32>
    %56 = arith.addf %53, %55 : vector<12x32xf32>
    %cst_31 = arith.constant 0.000000e+00 : f32
    %57 = vector.broadcast %cst_31 : f32 to vector<12x32xf32>
    %58 = arith.maximumf %56, %57 : vector<12x32xf32>
    %cst_32 = arith.constant 6.000000e+00 : f32
    %59 = vector.broadcast %cst_32 : f32 to vector<12x32xf32>
    %60 = arith.minimumf %58, %59 : vector<12x32xf32>
    %c136 = arith.constant 136 : index
    %c0_33 = arith.constant 0 : index
    %61 = vector.load %arg5[%c136, %c0_33] : memref<280x32xf32, #tpu.memory_space<vmem>>, vector<32x32xf32>
    %cst_34 = arith.constant dense<0.000000e+00> : vector<12x32xf32>
    %62 = tpu.matmul %60, %61, %cst_34 {dimension_numbers = #tpu.dot_dimension_numbers<[1], [0], [0], [1], [0, 0, 1, 1], [], []>} : vector<12x32xf32>, vector<32x32xf32>, vector<12x32xf32> -> vector<12x32xf32>
    %c168 = arith.constant 168 : index
    %c0_35 = arith.constant 0 : index
    %63 = vector.load %arg5[%c168, %c0_35] : memref<280x32xf32, #tpu.memory_space<vmem>>, vector<1x32xf32>
    %64 = vector.broadcast %63 : vector<1x32xf32> to vector<12x32xf32>
    %65 = arith.addf %62, %64 : vector<12x32xf32>
    %cst_36 = arith.constant 0.000000e+00 : f32
    %66 = vector.broadcast %cst_36 : f32 to vector<12x32xf32>
    %67 = arith.maximumf %65, %66 : vector<12x32xf32>
    %cst_37 = arith.constant 6.000000e+00 : f32
    %68 = vector.broadcast %cst_37 : f32 to vector<12x32xf32>
    %69 = arith.minimumf %67, %68 : vector<12x32xf32>
    %c176 = arith.constant 176 : index
    %c0_38 = arith.constant 0 : index
    %70 = vector.load %arg5[%c176, %c0_38] : memref<280x32xf32, #tpu.memory_space<vmem>>, vector<1x32xf32>
    %71 = vector.broadcast %70 : vector<1x32xf32> to vector<12x32xf32>
    %72 = arith.mulf %69, %71 : vector<12x32xf32>
    %cst_39 = arith.constant dense<0.000000e+00> : vector<12xf32>
    %73 = vector.multi_reduction <add>, %72, %cst_39 [1] : vector<12x32xf32> to vector<12xf32>
    %74 = vector.shape_cast %73 : vector<12xf32> to vector<12x1xf32>
    %c184 = arith.constant 184 : index
    %c0_40 = arith.constant 0 : index
    %75 = vector.load %arg5[%c184, %c0_40] : memref<280x32xf32, #tpu.memory_space<vmem>>, vector<1x1xf32>
    %76 = vector.broadcast %75 : vector<1x1xf32> to vector<12x1xf32>
    %77 = arith.addf %74, %76 : vector<12x1xf32>
    %78 = tpu.iota {dimensions = array<i32: 0>} : vector<12x1xi32>
    %c0_41 = arith.constant 0 : index
    %c0_42 = arith.constant 0 : index
    %c0_43 = arith.constant 0 : index
    %79 = vector.load %arg4[%c0_41, %c0_42, %c0_43] : memref<1x12x2xf32, #tpu.memory_space<vmem>>, vector<1x12x2xf32>
    %80 = vector.shape_cast %79 : vector<1x12x2xf32> to vector<12x2xf32>
    %81 = vector.broadcast %3 : i32 to vector<12x1xi32>
    %82 = arith.cmpi slt, %78, %81 : vector<12x1xi32>
    %83 = vector.extract_strided_slice %80 {offsets = [0, 0], sizes = [12, 1], strides = [1, 1]} : vector<12x2xf32> to vector<12x1xf32>
    %84 = arith.addf %77, %83 : vector<12x1xf32>
    %cst_44 = arith.constant -1.000000e+30 : f32
    %85 = vector.broadcast %cst_44 : f32 to vector<12x1xf32>
    %86 = arith.select %82, %84, %85 : vector<12x1xi1>, vector<12x1xf32>
    %cst_45 = arith.constant dense<0xFF800000> : vector<1xf32>
    %87 = vector.multi_reduction <maximumf>, %86, %cst_45 [0] : vector<12x1xf32> to vector<1xf32>
    %88 = vector.shape_cast %87 : vector<1xf32> to vector<1x1xf32>
    %89 = vector.broadcast %88 : vector<1x1xf32> to vector<12x1xf32>
    %90 = arith.cmpf oge, %86, %89 : vector<12x1xf32>
    %c12_i32 = arith.constant 12 : i32
    %91 = vector.broadcast %c12_i32 : i32 to vector<12x1xi32>
    %92 = arith.select %90, %78, %91 : vector<12x1xi1>, vector<12x1xi32>
    %cst_46 = arith.constant dense<2147483647> : vector<1xi32>
    %93 = vector.multi_reduction <minsi>, %92, %cst_46 [0] : vector<12x1xi32> to vector<1xi32>
    %94 = vector.shape_cast %93 : vector<1xi32> to vector<1x1xi32>
    %95 = vector.broadcast %94 : vector<1x1xi32> to vector<12x1xi32>
    %96 = arith.cmpi eq, %78, %95 : vector<12x1xi32>
    %cst_47 = arith.constant 0.000000e+00 : f32
    %97 = vector.shape_cast %96 : vector<12x1xi1> to vector<12x1xi1>
    %98 = vector.broadcast %97 : vector<12x1xi1> to vector<12x32xi1>
    %99 = vector.broadcast %cst_47 : f32 to vector<12x32xf32>
    %100 = arith.select %98, %60, %99 : vector<12x32xi1>, vector<12x32xf32>
    %cst_48 = arith.constant dense<0.000000e+00> : vector<32xf32>
    %101 = vector.multi_reduction <add>, %100, %cst_48 [0] : vector<12x32xf32> to vector<32xf32>
    %102 = vector.shape_cast %101 : vector<32xf32> to vector<1x32xf32>
    %c192 = arith.constant 192 : index
    %c0_49 = arith.constant 0 : index
    %103 = vector.load %arg5[%c192, %c0_49] : memref<280x32xf32, #tpu.memory_space<vmem>>, vector<32x32xf32>
    %cst_50 = arith.constant dense<0.000000e+00> : vector<12x32xf32>
    %104 = tpu.matmul %60, %103, %cst_50 {dimension_numbers = #tpu.dot_dimension_numbers<[1], [0], [0], [1], [0, 0, 1, 1], [], []>} : vector<12x32xf32>, vector<32x32xf32>, vector<12x32xf32> -> vector<12x32xf32>
    %c224 = arith.constant 224 : index
    %c0_51 = arith.constant 0 : index
    %105 = vector.load %arg5[%c224, %c0_51] : memref<280x32xf32, #tpu.memory_space<vmem>>, vector<32x32xf32>
    %cst_52 = arith.constant dense<0.000000e+00> : vector<1x32xf32>
    %106 = tpu.matmul %102, %105, %cst_52 {dimension_numbers = #tpu.dot_dimension_numbers<[1], [0], [0], [1], [0, 0, 1, 1], [], []>} : vector<1x32xf32>, vector<32x32xf32>, vector<1x32xf32> -> vector<1x32xf32>
    %107 = vector.broadcast %106 : vector<1x32xf32> to vector<12x32xf32>
    %108 = arith.addf %104, %107 : vector<12x32xf32>
    %c256 = arith.constant 256 : index
    %c0_53 = arith.constant 0 : index
    %109 = vector.load %arg5[%c256, %c0_53] : memref<280x32xf32, #tpu.memory_space<vmem>>, vector<1x32xf32>
    %110 = vector.broadcast %109 : vector<1x32xf32> to vector<12x32xf32>
    %111 = arith.addf %108, %110 : vector<12x32xf32>
    %cst_54 = arith.constant 0.000000e+00 : f32
    %112 = vector.broadcast %cst_54 : f32 to vector<12x32xf32>
    %113 = arith.maximumf %111, %112 : vector<12x32xf32>
    %cst_55 = arith.constant 6.000000e+00 : f32
    %114 = vector.broadcast %cst_55 : f32 to vector<12x32xf32>
    %115 = arith.minimumf %113, %114 : vector<12x32xf32>
    %c264 = arith.constant 264 : index
    %c0_56 = arith.constant 0 : index
    %116 = vector.load %arg5[%c264, %c0_56] : memref<280x32xf32, #tpu.memory_space<vmem>>, vector<1x32xf32>
    %117 = vector.broadcast %116 : vector<1x32xf32> to vector<12x32xf32>
    %118 = arith.mulf %115, %117 : vector<12x32xf32>
    %cst_57 = arith.constant dense<0.000000e+00> : vector<12xf32>
    %119 = vector.multi_reduction <add>, %118, %cst_57 [1] : vector<12x32xf32> to vector<12xf32>
    %120 = vector.shape_cast %119 : vector<12xf32> to vector<12x1xf32>
    %c272 = arith.constant 272 : index
    %c0_58 = arith.constant 0 : index
    %121 = vector.load %arg5[%c272, %c0_58] : memref<280x32xf32, #tpu.memory_space<vmem>>, vector<1x1xf32>
    %122 = vector.broadcast %121 : vector<1x1xf32> to vector<12x1xf32>
    %123 = arith.addf %120, %122 : vector<12x1xf32>
    %124 = vector.broadcast %1 : i32 to vector<12x1xi32>
    %125 = arith.cmpi slt, %78, %124 : vector<12x1xi32>
    %126 = vector.broadcast %94 : vector<1x1xi32> to vector<12x1xi32>
    %127 = arith.cmpi ne, %78, %126 : vector<12x1xi32>
    %128 = arith.andi %125, %127 : vector<12x1xi1>
    %129 = vector.extract_strided_slice %80 {offsets = [0, 1], sizes = [12, 1], strides = [1, 1]} : vector<12x2xf32> to vector<12x1xf32>
    %130 = arith.addf %123, %129 : vector<12x1xf32>
    %cst_59 = arith.constant -1.000000e+30 : f32
    %131 = vector.broadcast %cst_59 : f32 to vector<12x1xf32>
    %132 = arith.select %128, %130, %131 : vector<12x1xi1>, vector<12x1xf32>
    %cst_60 = arith.constant dense<0xFF800000> : vector<1xf32>
    %133 = vector.multi_reduction <maximumf>, %132, %cst_60 [0] : vector<12x1xf32> to vector<1xf32>
    %134 = vector.shape_cast %133 : vector<1xf32> to vector<1x1xf32>
    %135 = vector.broadcast %134 : vector<1x1xf32> to vector<12x1xf32>
    %136 = arith.cmpf oge, %132, %135 : vector<12x1xf32>
    %c12_i32_61 = arith.constant 12 : i32
    %137 = vector.broadcast %c12_i32_61 : i32 to vector<12x1xi32>
    %138 = arith.select %136, %78, %137 : vector<12x1xi1>, vector<12x1xi32>
    %cst_62 = arith.constant dense<2147483647> : vector<1xi32>
    %139 = vector.multi_reduction <minsi>, %138, %cst_62 [0] : vector<12x1xi32> to vector<1xi32>
    %140 = vector.shape_cast %139 : vector<1xi32> to vector<1x1xi32>
    %141 = tpu.iota {dimensions = array<i32: 1>} : vector<12x2xi32>
    %c0_i32 = arith.constant 0 : i32
    %142 = vector.broadcast %c0_i32 : i32 to vector<12x2xi32>
    %143 = arith.cmpi eq, %141, %142 : vector<12x2xi32>
    %144 = vector.shape_cast %77 : vector<12x1xf32> to vector<12x1xf32>
    %145 = vector.broadcast %144 : vector<12x1xf32> to vector<12x2xf32>
    %146 = vector.shape_cast %123 : vector<12x1xf32> to vector<12x1xf32>
    %147 = vector.broadcast %146 : vector<12x1xf32> to vector<12x2xf32>
    %148 = arith.select %143, %145, %147 : vector<12x2xi1>, vector<12x2xf32>
    %c0_63 = arith.constant 0 : index
    %c0_64 = arith.constant 0 : index
    %c0_65 = arith.constant 0 : index
    %149 = vector.load %arg6[%c0_63, %c0_64, %c0_65] : memref<1x13x2xf32, #tpu.memory_space<vmem>>, vector<1x12x2xf32>
    %150 = vector.shape_cast %149 : vector<1x12x2xf32> to vector<12x2xf32>
    %151 = vector.shape_cast %148 : vector<12x2xf32> to vector<1x12x2xf32>
    tpu.vector_store %arg6[%c0_63, %c0_64, %c0_65], %151 {strides = array<i32>} : memref<1x13x2xf32, #tpu.memory_space<vmem>>, vector<1x12x2xf32>,
    %152 = tpu.iota {dimensions = array<i32: 1>} : vector<1x2xi32>
    %c0_i32_66 = arith.constant 0 : i32
    %153 = vector.broadcast %c0_i32_66 : i32 to vector<1x2xi32>
    %154 = arith.cmpi eq, %152, %153 : vector<1x2xi32>
    %155 = arith.sitofp %94 : vector<1x1xi32> to vector<1x1xf32>
    %156 = arith.sitofp %140 : vector<1x1xi32> to vector<1x1xf32>
    %157 = vector.shape_cast %155 : vector<1x1xf32> to vector<1x1xf32>
    %158 = vector.broadcast %157 : vector<1x1xf32> to vector<1x2xf32>
    %159 = vector.shape_cast %156 : vector<1x1xf32> to vector<1x1xf32>
    %160 = vector.broadcast %159 : vector<1x1xf32> to vector<1x2xf32>
    %161 = arith.select %154, %158, %160 : vector<1x2xi1>, vector<1x2xf32>
    %c0_67 = arith.constant 0 : index
    %c12 = arith.constant 12 : index
    %c0_68 = arith.constant 0 : index
    %162 = vector.load %arg6[%c0_67, %c12, %c0_68] : memref<1x13x2xf32, #tpu.memory_space<vmem>>, vector<1x1x2xf32>
    %163 = vector.shape_cast %162 : vector<1x1x2xf32> to vector<1x2xf32>
    %164 = vector.shape_cast %161 : vector<1x2xf32> to vector<1x1x2xf32>
    tpu.vector_store %arg6[%c0_67, %c12, %c0_68], %164 {strides = array<i32>} : memref<1x13x2xf32, #tpu.memory_space<vmem>>, vector<1x1x2xf32>,
    return
  }
  func.func @transform_0(%arg0: i32, %arg1: memref<2x2xi32, #tpu.memory_space<smem>>) -> (i32, i32, i32) {
    %c0_i32 = arith.constant 0 : i32
    %c0_i32_0 = arith.constant 0 : i32
    %c0_i32_1 = arith.constant 0 : i32
    return %arg0, %c0_i32, %c0_i32_0 : i32, i32, i32
  }
  func.func @transform_1(%arg0: i32, %arg1: memref<2x2xi32, #tpu.memory_space<smem>>) -> (i32, i32, i32) {
    %c0_i32 = arith.constant 0 : i32
    %c0_i32_0 = arith.constant 0 : i32
    %c0_i32_1 = arith.constant 0 : i32
    return %arg0, %c0_i32, %c0_i32_0 : i32, i32, i32
  }
  func.func @transform_2(%arg0: i32, %arg1: memref<2x2xi32, #tpu.memory_space<smem>>) -> (i32, i32, i32) {
    %c0_i32 = arith.constant 0 : i32
    %c0_i32_0 = arith.constant 0 : i32
    %c0_i32_1 = arith.constant 0 : i32
    return %arg0, %c0_i32, %c0_i32_0 : i32, i32, i32
  }
  func.func @transform_3(%arg0: i32, %arg1: memref<2x2xi32, #tpu.memory_space<smem>>) -> (i32, i32) {
    %c0_i32 = arith.constant 0 : i32
    %c0_i32_0 = arith.constant 0 : i32
    %c0_i32_1 = arith.constant 0 : i32
    return %c0_i32, %c0_i32_0 : i32, i32
  }
  func.func @transform_4(%arg0: i32, %arg1: memref<2x2xi32, #tpu.memory_space<smem>>) -> (i32, i32, i32) {
    %c0_i32 = arith.constant 0 : i32
    %c0_i32_0 = arith.constant 0 : i32
    %c0_i32_1 = arith.constant 0 : i32
    return %arg0, %c0_i32, %c0_i32_0 : i32, i32, i32
  }
}

</mosaic_0001>

<bundles_post_ra>
// kernel: policy_forward.1
= control target key start
LH: loop header
LB: loop body
LE: loop exit
PB: predicated region body
PF: predicated region fallthrough
CT: control target
= control target key end

     0   :  { %s2023_s0 = inlined_call_operand.vmem [shape: s32[2,2], index: 0, kind: input, shape index: {}]   ;;  %s2024_s1 = inlined_call_operand.vmem [shape: f32[2,12,12], index: 1, kind: input, shape index: {}]   ;;  %s2025_s2 = inlined_call_operand.vmem [shape: f32[2,12,8], index: 2, kind: input, shape index: {}]   ;;  %s2026_s3 = inlined_call_operand.vmem [shape: f32[2,12,2], index: 3, kind: input, shape index: {}]   ;;  %s2027_s4 = inlined_call_operand.vmem [shape: f32[280,32], index: 4, kind: input, shape index: {}]   ;;  %s2028_s5 = inlined_call_operand.vmem [shape: f32[2,13,2], index: 5, kind: output, shape index: {}]  }
   0x1   :  { %s10_s20 = sshll.u32 %s2023_s0, 4  ;;  %s11_s20 = int_to_ptr.vmem [resolvable:$true] %s10_s20 }
   0x2   :  { %s1711_s21 = scalar_lea.vmem %s11_s20, 32  ;;  %p1716_p1 = scmp.lt.s32.totalorder %s11_s20, %s11_s20 }
   0x3   :  { %p1712_p0 = scmp.ne.s32.totalorder %s11_s20, %s1711_s21  ;;  %p1717_p2 = scmp.lt.s32.totalorder %s1711_s21, %s1711_s21 }
   0x5   :  { %p1718_p3 = por %p1717_p2, %p1716_p1 }
   0x7   :  { %p1719_p4 = pnand %p1718_p3, %p1712_p0 }
   0x9   :  { %1722 = shalt.err (!%p1719_p4)  }
   0xa   :  { %s1733_s22 = smov [#allocation3]  }
   0xb   :  { %13 = dma.vmem_to_smem %s11_s20, 32, %s1733_s22, [#allocation2] }
   0xc   :  { %1727 = dma.done.wait [#allocation2], 32 }
   0xd   :  { %1728 = vsyncadd [#allocation2], 4294967264 }
   0xe   :  { %15 = sfence }
   0xf   :  { %s1773_s23 = smov 0  }
  0x10 LB: > { %s1779_s0 = sadd.s32 4294967295, %s1731_s23   ;;  %p1434_p5 = scmp.ge.s32.totalorder %s1731_s23, 1  ;;  %s1731_s23 = sphi %s1773_s23, %s21_s23  }
  0x11   : > { %p189_p6 = scmp.lt.s32.totalorder %s1731_s23, 3 }
  0x13   : > { %p190_p7 = pnand %p1434_p5, %p189_p6 }
  0x14   : > { %v281_v0 = vld [vmem:[%s2027_s4] sm:$0xff] (!%p190_p7)  ;;  %p225_p8 = scmp.lt.s32.totalorder (!%p190_p7), %s1779_s0, 1  ;;  %vm287_vm0 = vcmask (!%p190_p7), 64512   ;;  %vm251_vm1 = vcmask (!%p190_p7), 97280   ;;  %vm253_vm2 = vcmask (!%p190_p7), 93184   ;;  %v454_v18 = vld [vmem:[%s2027_s4 + $0x10] sm:$0xff] (!%p190_p7) }
  0x15   : > { %193 = sbr.rel (%p190_p7) target bundleno = 2661 (0xa65), region = 36  ;;  %1532 = vmatprep.subr.mxu0 (!%p190_p7), %v281_v0  ;;  %v455_v19 = vld [vmem:[%s2027_s4 + $0x18] sm:$0xff] (!%p190_p7)  ;;  %v456_v20 = vld [vmem:[%s2027_s4 + $0x20] sm:$0xff] (!%p190_p7)  ;;  %v457_v22 = vld [vmem:[%s2027_s4 + $0x28] sm:$0xff] (!%p190_p7)  ;;  %vm375_vm5 = vcmask (!%p190_p7), 1043456   ;;  %vm1734_vm7 = vmmov (!%p190_p7), 1  }
  0x16   : > { %1533 = vmatpush3.msra.mxu0 (!%p190_p7), %v281_v0  ;;  %v1630_v21 = vpack.c.bf16 (!%p190_p7), %v455_v19, %v454_v18  ;;  %v1634_v23 = vpack.c.bf16 (!%p190_p7), %v457_v22, %v456_v20  ;;  %v1444_v29 = vld [vmem:[%s2027_s4 + $0x8] ss:$0 sm:$0xff] (!%p190_p7)  ;;  %vm1815_vm8 = vmpackc.low (!%p190_p7), %vm375_vm5, %vm1734_vm7  ;;  %vm463_vm9 = vcmask (!%p190_p7), 261120   ;;  %v1450_v41 = vld [vmem:[%s2027_s4 + $0x30] ss:$0 sm:$0xff] (!%p190_p7)  ;;  %vm997_vm10 = vcmask (!%p190_p7), 257024  }
  0x17   : > { %v627_v49 = vld [vmem:[%s2027_s4 + $0x38] sm:$0xff] (!%p190_p7)  ;;  %v628_v50 = vld [vmem:[%s2027_s4 + $0x40] sm:$0xff] (!%p190_p7)  ;;  %v629_v54 = vld [vmem:[%s2027_s4 + $0x48] sm:$0xff] (!%p190_p7)  ;;  %s1443_s15 = sshll.u32 (!%p190_p7), %s1779_s0, 7  ;;  %vm1020_vm13 = vcmask (!%p190_p7), 7168   ;;  %vm1022_vm14 = vcmask (!%p190_p7), 3072  }
  0x18   : > { %1631 = vmatprep.subr.bf16.mxu0 (!%p190_p7), %v1630_v21  ;;  %v1644_v53 = vpack.c.bf16 (!%p190_p7), %v628_v50, %v627_v49  ;;  %v630_v55 = vld [vmem:[%s2027_s4 + $0x50] sm:$0xff] (!%p190_p7)  ;;  %v1456_v59 = vld [vmem:[%s2027_s4 + $0x58] ss:$0 sm:$0xff] (!%p190_p7)  ;;  %v1071_v19 = vld [vmem:[%s2027_s4 + $0xc0] sm:$0xff] (!%p190_p7)  ;;  %v1735_v50 = vmov (!%p190_p7), 0   ;;  %s247_s16 = sadd.s32 (!%p190_p7), 1, %s1443_s15 }
  0x19   : > { %v1648_v56 = vpack.c.bf16 (!%p190_p7), %v630_v55, %v629_v54  ;;  %v1072_v20 = vld [vmem:[%s2027_s4 + $0xc8] sm:$0xff] (!%p190_p7)  ;;  %v1462_v22 = vld [vmem:[%s2027_s4 + $0x80] ss:$0 sm:$0xff] (!%p190_p7)  ;;  %1704 = vset.pattern.permute.xlu1 (!%p190_p7), %v1735_v50  ;;  %1703 = vset.pattern.permute.xlu0 (!%p190_p7), %v1735_v50  ;;  %s248_s17 = sld [smem:[#allocation3 + %s247_s16]] (!%p190_p7)  ;;  %vm1737_vm7 = vmmov (!%p190_p7), 0   ;;  %s1739_s12 = smov (!%p190_p7), 127  }
  0x1a   : > { %s246_s13 = sld [smem:[#allocation3 + %s1443_s15]] (!%p190_p7) }
  0x1c   : > { %s226_s26 = scalar_select %p225_p8, %s1779_s0, 1 }
  0x1e   : > { %s1788_s27 = sshll.u32 %s226_s26, 4 }
  0x1f   : > { %s234_s30 = scalar_lea.vmem %s2025_s2, %s1788_s27  ;;  %s229_s8 = scalar_lea.vmem %s2024_s1, %s1788_s27 }
  0x20   : > { %v279_v1 = vld [vmem:[%s234_s30] sm:$0xff]  ;;  %v280_v2 = vld [vmem:[%s234_s30 + $0x8] sm:$0xf]  ;;  %s239_s20 = scalar_lea.vmem %s2026_s3, %s1788_s27 }
  0x21   : > { %v249_v3 = vld [vmem:[%s229_s8] sm:$0xff]  ;;  %1534 = vmatprep.mubr.msk.f32.mxu0 %vm287_vm0, %v279_v1  ;;  %v250_v5 = vld [vmem:[%s229_s8 + $0x8] sm:$0xf] }
  0x22   : > { %v252_v4 = vsel %vm251_vm1, %v249_v3, 0.0  ;;  %1535 = vmatmul.mubr.msk.f32.vlgmr.msra.gmra.mrb[0].mxu0 %vm287_vm0, %v280_v2  ;;  %v254_v6 = vsel %vm253_vm2, %v250_v5, 0.0  ;;  %v1936_v54 = vld [vmem:[%s239_s20] sm:$0xff] }
  0x23   : > { %262 = vadd.xlane.f32.xlu0 %v252_v4  ;;  %v255_v7 = vadd.f32 %v254_v6, %v252_v4  ;;  %1633 = vmatpush3.bf16.msra.mxu0 %v1630_v21  ;;  %v800_v4 = vld [vmem:[%s2027_s4 + $0x68] sm:$0xff]  ;;  %v1680_v21 = vpack.c.bf16 %v1072_v20, %v1071_v19 }
  0x24   : > { %1635 = vmatprep.subr.bf16.mxu0 %v1634_v23 }
  0x25   : > { %v256_v8 = vrot.slane %v255_v7, 4 }
  0x27   : > { %264 = vadd.xlane.f32.xlu0 %v254_v6  ;;  %v257_v9 = vadd.f32 %v256_v8, %v255_v7  ;;  %1637 = vmatpush3.bf16.msra.mxu0 %v1634_v23  ;;  %v801_v8 = vld [vmem:[%s2027_s4 + $0x70] sm:$0xff] }
  0x29   : > { %v258_v10 = vrot.slane %v257_v9, 2 }
  0x2b   : > { %v259_v11 = vadd.f32 %v258_v10, %v257_v9  ;;  %v802_v9 = vld [vmem:[%s2027_s4 + $0x78] sm:$0xff] }
  0x2c   : > { %v1662_v10 = vpack.c.bf16 %v802_v9, %v801_v8 }
  0x2d   : > { %v260_v12 = vrot.slane %v259_v11, 1 }
  0x2f   : > { %v261_v13 = vadd.f32 %v260_v12, %v259_v11 }
  0x31   : > { %1705 = vrsqrt.f32 %v261_v13  ;;  %vm266_vm3 = vcmp.gt.f32.partialorder %v261_v13, 0.0  ;;  %v893_v13 = vld [vmem:[%s2027_s4 + $0x88] sm:$0xff] }
  0x3b   : > { %v1706_v14 = vpop.eup %1705 }
  0x3c   : > { %v268_v15 = vsel %vm266_vm3, %v1706_v14, 0.0  ;;  %v894_v14 = vld [vmem:[%s2027_s4 + $0x90] sm:$0xff] }
  0x3d   : > { %v275_v16 = vmul.f32 %v268_v15, %v249_v3  ;;  %v276_v17 = vmul.f32 %v268_v15, %v250_v5  ;;  %v799_v3 = vld [vmem:[%s2027_s4 + $0x60] sm:$0xff]  ;;  %v1666_v15 = vpack.c.bf16 %v894_v14, %v893_v13 }
  0x3e   : > { %v1658_v7 = vpack.c.bf16 %v800_v4, %v799_v3 }
  0xb0   : > { %v263_v24 = vpop.xlane.xlu0 %262 }
  0xb1   : > { %1707 = vrsqrt.f32 %v263_v24  ;;  %vm269_vm4 = vcmp.gt.f32.partialorder %v263_v24, 0.0 }
  0xb4   : > { %v265_v28 = vpop.xlane.xlu0 %264 }
  0xb5   : > { %1709 = vrsqrt.f32 %v265_v28  ;;  %vm270_vm6 = vcmp.gt.f32.partialorder %v265_v28, 0.0 }
  0xbb   : > { %v1708_v25 = vpop.eup %1707 }
  0xbc   : > { %v273_v26 = vsel %vm269_vm4, %v1708_v25, 0.0 }
  0xbd   : > { %v277_v27 = vmul.f32 %v275_v16, %v273_v26  ;;  %v895_v16 = vld [vmem:[%s2027_s4 + $0x98] sm:$0xff] }
  0xbf   : > { %1541 = vmatprep.mubr.msk.f32.mxu1 %vm251_vm1, %v277_v27  ;;  %v1710_v33 = vpop.eup %1709 }
  0xc0   : > { %v274_v37 = vsel %vm270_vm6, %v1710_v33, 0.0 }
  0xc1   : > { %v278_v38 = vmul.f32 %v276_v17, %v274_v37  ;;  %v896_v17 = vld [vmem:[%s2027_s4 + $0xa0] sm:$0xff] }
  0xc2   : > { %v1670_v18 = vpack.c.bf16 %v896_v17, %v895_v16 }
  0xf5   : > { %v1536_v30 = vpop.f32.mrb[0].mxu0 }
  0xf6   : > { %v366_v31 = vadd.f32 %v1536_v30, %v1444_v29  ;;  %v360_v32 = vpop.f32.mrb[1].mxu0  ;;  %v1074_v30 = vld [vmem:[%s2027_s4 + $0xd8] sm:$0xff] }
  0xf7   : > { %v361_v34 = vadd.f32 %v1444_v29, %v360_v32  ;;  %v1073_v29 = vld [vmem:[%s2027_s4 + $0xd0] sm:$0xff] }
  0xf8   : > { %v1684_v33 = vpack.c.bf16 %v1074_v30, %v1073_v29  ;;  %v1078_v29 = vld [vmem:[%s2027_s4 + $0xf8] sm:$0xff] }
  0xf9   : > { %v1624_v36 = vpack.c.bf16 %v366_v31, %v361_v34  ;;  %v1465_v34 = vld [vmem:[%s2027_s4 + $0xa8] ss:$0 sm:$0xff] }
  0xfb   : > { %1626 = vmatprep.subr.msk.bf16.mxu1 %vm1815_vm8, %v1624_v36 }
  0xfc   : > { %1629 = vmatpush3.bf16.msk.msra.mxu1 %vm1815_vm8, %v1624_v36 }
  0xff   : > { %1542 = vmatmul.mubr.msk.f32.vlgmr.msra.gmra.mrb[0].mxu1 %vm251_vm1, %v278_v38 }
 0x100   : > { %1559 = vmatprep.mubr.msk.f32.mxu1 %vm251_vm1, %v277_v27 }
 0x1d2   : > { %v1543_v39 = vpop.f32.mrb[0].mxu1 }
 0x1d3   : > { %v445_v40 = vpop.f32.mrb[1].mxu1 }
 0x1d4   : > { %1552 = vmatprep.mubr.msk.f32.mxu0 %vm463_vm9, %v445_v40 }
 0x1d5   : > { %1553 = vmatmul.mubr.msk.f32.vlgmr.msra.gmra.mrb[2].mxu0 %vm463_vm9, %v1543_v39 }
 0x1d6   : > { %1577 = vmatprep.mubr.msk.f32.mxu0 %vm251_vm1, %v277_v27 }
 0x2a8   : > { %v1554_v42 = vpop.f32.mrb[2].mxu0 }
 0x2a9   : > { %v542_v43 = vadd.f32 %v1554_v42, %v1450_v41  ;;  %v536_v44 = vpop.f32.mrb[3].mxu0 }
 0x2aa   : > { %v537_v45 = vadd.f32 %v1450_v41, %v536_v44  ;;  %v1468_v41 = vld [vmem:[%s2027_s4 + $0xb0] ss:$0 sm:$0xff] }
 0x2ab   : > { %v546_v46 = vmax.f32 %v542_v43, 0.0 }
 0x2ac   : > { %v545_v47 = vmax.f32 %v537_v45, 0.0 }
 0x2ad   : > { %v548_v48 = vmin.f32 %v546_v46, 6.0 }
 0x2ae   : > { %v547_v51 = vmin.f32 %v545_v47, 6.0 }
 0x2b0   : > { %v1638_v52 = vpack.c.bf16 %v548_v48, %v547_v51  ;;  %v1008_v51 = vlaneseq }
 0x2b2   : > { %1640 = vmatprep.subr.msk.bf16.mxu1 %vm1815_vm8, %v1638_v52 }
 0x2b3   : > { %1643 = vmatpush3.bf16.msk.msra.mxu1 %vm1815_vm8, %v1638_v52  ;;  %v1469_v52 = vld [vmem:[%s2027_s4 + $0xb8] ss:$0 sm:$0xff] }
 0x2b4   : > { %1645 = vmatprep.subr.bf16.mxu1 %v1644_v53 }
 0x2b6   : > { %1560 = vmatmul.mubr.msk.f32.vlgmr.msra.gmra.mrb[2].mxu1 %vm251_vm1, %v278_v38 }
 0x2b7   : > { %1647 = vmatpush3.bf16.msra.mxu1 %v1644_v53  ;;  %v1934_v53 = vshrl.u32 %v1008_v51, 7 }
 0x2b8   : > { %1649 = vmatprep.subr.bf16.mxu1 %v1648_v56 }
 0x2bb   : > { %1651 = vmatpush3.bf16.msra.mxu1 %v1648_v56  ;;  %v1013_v56 = vstv %s248_s17  ;;  %s244_s17 = scalar_lea.vmem %s2028_s5, %s1788_s27 }
 0x2bc   : > { %1667 = vmatprep.subr.bf16.mxu1 %v1666_v15  ;;  %vm1014_vm11 = vcmp.lt.s32.totalorder %v1934_v53, %v1013_v56 }
 0x389   : > { %v1561_v57 = vpop.f32.mrb[2].mxu1 }
 0x38a   : > { %v618_v58 = vpop.f32.mrb[3].mxu1 }
 0x38b   : > { %1570 = vmatprep.mubr.msk.f32.mxu1 %vm463_vm9, %v618_v58  ;;  %v1941_v58 = vadd.s32 8, %v1934_v53 }
 0x38c   : > { %1571 = vmatmul.mubr.msk.f32.vlgmr.msra.gmra.mrb[4].mxu1 %vm463_vm9, %v1561_v57 }
 0x38d   : > { %1669 = vmatpush3.bf16.msra.mxu1 %v1666_v15  ;;  %vm1015_vm12 = vcmp.lt.s32.totalorder %v1941_v58, %v1013_v56 }
 0x38e   : > { %1671 = vmatprep.subr.bf16.mxu1 %v1670_v18 }
 0x391   : > { %1673 = vmatpush3.bf16.msra.mxu1 %v1670_v18 }
 0x392   : > { %1681 = vmatprep.subr.bf16.mxu1 %v1680_v21 }
 0x45f   : > { %v1572_v60 = vpop.f32.mrb[4].mxu1 }
 0x460   : > { %v714_v61 = vadd.f32 %v1572_v60, %v1456_v59  ;;  %v708_v62 = vpop.f32.mrb[5].mxu1  ;;  %v1946_v60 = vld [vmem:[%s239_s20 + $0x8] sm:$0xf] }
 0x461   : > { %v709_v63 = vadd.f32 %v1456_v59, %v708_v62 }
 0x462   : > { %v718_v0 = vmax.f32 %v714_v61, 0.0 }
 0x463   : > { %v717_v1 = vmax.f32 %v709_v63, 0.0 }
 0x464   : > { %v720_v2 = vmin.f32 %v718_v0, 6.0 }
 0x465   : > { %v719_v5 = vmin.f32 %v717_v1, 6.0 }
 0x467   : > { %v1652_v6 = vpack.c.bf16 %v720_v2, %v719_v5 }
 0x469   : > { %1654 = vmatprep.subr.msk.bf16.mxu0 %vm1815_vm8, %v1652_v6 }
 0x46a   : > { %1657 = vmatpush3.bf16.msk.msra.mxu0 %vm1815_vm8, %v1652_v6 }
 0x46b   : > { %1659 = vmatprep.subr.bf16.mxu0 %v1658_v7 }
 0x46d   : > { %1578 = vmatmul.mubr.msk.f32.vlgmr.msra.gmra.mrb[4].mxu0 %vm251_vm1, %v278_v38 }
 0x46e   : > { %1661 = vmatpush3.bf16.msra.mxu0 %v1658_v7 }
 0x46f   : > { %1663 = vmatprep.subr.bf16.mxu0 %v1662_v10 }
 0x472   : > { %1665 = vmatpush3.bf16.msra.mxu0 %v1662_v10 }
 0x540   : > { %v1579_v11 = vpop.f32.mrb[4].mxu0 }
 0x541   : > { %v790_v12 = vpop.f32.mrb[5].mxu0 }
 0x542   : > { %1588 = vmatprep.mubr.msk.f32.mxu0 %vm463_vm9, %v790_v12 }
 0x543   : > { %1589 = vmatmul.mubr.msk.f32.vlgmr.msra.gmra.mrb[6].mxu0 %vm463_vm9, %v1579_v11 }
 0x616   : > { %v1590_v23 = vpop.f32.mrb[6].mxu0 }
 0x617   : > { %v886_v24 = vadd.f32 %v1590_v23, %v1462_v22  ;;  %v880_v25 = vpop.f32.mrb[7].mxu0 }
 0x618   : > { %v881_v26 = vadd.f32 %v1462_v22, %v880_v25  ;;  %v1076_v25 = vld [vmem:[%s2027_s4 + $0xe8] sm:$0xff] }
 0x619   : > { %v890_v27 = vmax.f32 %v886_v24, 0.0  ;;  %v1075_v24 = vld [vmem:[%s2027_s4 + $0xe0] sm:$0xff] }
 0x61a   : > { %v889_v28 = vmax.f32 %v881_v26, 0.0  ;;  %v1675_v26 = vpack.c.bf16 %v1076_v25, %v1075_v24 }
 0x61b   : > { %v1901_v32 = vmin.f32 %v890_v27, 6.0  ;;  %v1736_v27 = vmov 0.0|0.0  }
 0x61c   : > { %v1899_v31 = vmin.f32 %v889_v28, 6.0  ;;  %1674 = vmatprep.subr.bf16.mxu0 %v1736_v27  ;;  %v1077_v28 = vld [vmem:[%s2027_s4 + $0xf0] sm:$0xff] }
 0x61d   : > { %1676 = vmatpush3.bf16.msra.mxu0 %v1675_v26  ;;  %v1678_v30 = vpack.c.bf16 %v1078_v29, %v1077_v28 }
 0x61e   : > { %1599 = vmatprep.mubr.msk.f32.mxu1 %vm463_vm9, %v1899_v31  ;;  %1677 = vmatprep.subr.bf16.mxu0 %v1736_v27 }
 0x61f   : > { %1600 = vmatmul.mubr.msk.f32.vlgmr.msra.gmra.mrb[6].mxu1 %vm463_vm9, %v1901_v32 }
 0x620   : > { %1683 = vmatpush3.bf16.msra.mxu1 %v1680_v21  ;;  %1621 = vmatprep.mubr.msk.f32.mxu1 %vm463_vm9, %v1899_v31 }
 0x621   : > { %1685 = vmatprep.subr.bf16.mxu1 %v1684_v33  ;;  %1679 = vmatpush3.bf16.msra.mxu0 %v1678_v30 }
 0x624   : > { %1687 = vmatpush3.bf16.msra.mxu1 %v1684_v33  ;;  %v1738_v33 = vmov 0.0  }
 0x625   : > { %1610 = vmatprep.mubr.msk.f32.mxu0 %vm1737_vm7, %v1738_v33 }
 0x627   : > { %1622 = vmatmul.mubr.msk.f32.vlgmr.msra.gmra.mrb[8].mxu1 %vm463_vm9, %v1901_v32 }
 0x6f2   : > { %v1601_v35 = vpop.f32.mrb[6].mxu1 }
 0x6f3   : > { %v980_v36 = vadd.f32 %v1601_v35, %v1465_v34  ;;  %v974_v37 = vpop.f32.mrb[7].mxu1 }
 0x6f4   : > { %v975_v38 = vadd.f32 %v1465_v34, %v974_v37 }
 0x6f5   : > { %v984_v39 = vmax.f32 %v980_v36, 0.0 }
 0x6f6   : > { %v983_v40 = vmax.f32 %v975_v38, 0.0 }
 0x6f7   : > { %v986_v42 = vmin.f32 %v984_v39, 6.0 }
 0x6f8   : > { %v985_v43 = vmin.f32 %v983_v40, 6.0 }
 0x6f9   : > { %v993_v48 = vmul.f32 %v1468_v41, %v986_v42 }
 0x6fa   : > { %v1917_v44 = vpop.f32.mrb[8].mxu1  ;;  %v992_v45 = vmul.f32 %v1468_v41, %v985_v43 }
 0x6fb   : > { %v1919_v46 = vpop.f32.mrb[9].mxu1  ;;  %v998_v49 = vsel %vm997_vm10, %v993_v48, 0.0 }
 0x6fc   : > { %v994_v47 = vsel %vm463_vm9, %v992_v45, 0.0 }
 0x6fd   : > { %995 = vadd.xlane.f32.xlu1 %v994_v47 }
 0x701   : > { %999 = vadd.xlane.f32.xlu1 %v998_v49  ;;  %v1154_v49 = vsub.s32 0, %v1934_v53 }
 0x78a   : > { %v996_v55 = vpop.xlane.xlu1 %995 }
 0x78b   : > { %v1938_v57 = vadd.f32 %v1469_v52, %v996_v55 }
 0x78d   : > { %v1016_v59 = vadd.f32 %v1936_v54, %v1938_v57 }
 0x78e   : > { %v1000_v61 = vpop.xlane.xlu1 %999 }
 0x78f   : > { %v1948_v62 = vadd.f32 %v1469_v52, %v1000_v61  ;;  %v1018_v63 = vsel %vm1014_vm11, %v1016_v59, -1e+30 }
 0x790   : > { %v1021_v2 = vsel %vm1020_vm13, %v1018_v63, -inf }
 0x791   : > { %v1017_v0 = vadd.f32 %v1946_v60, %v1948_v62 }
 0x793   : > { %v1019_v1 = vsel %vm1015_vm12, %v1017_v0, -1e+30 }
 0x794   : > { %v1023_v3 = vsel %vm1022_vm14, %v1019_v1, -inf }
 0x795   : > { %v1024_v4 = vmax.f32 %v1021_v2, %v1023_v3 }
 0x797   : > { %v1025_v5 = vrot.slane %v1024_v4, 4 }
 0x799   : > { %v1026_v6 = vmax.f32 %v1024_v4, %v1025_v5 }
 0x79b   : > { %v1027_v7 = vrot.slane %v1026_v6, 2 }
 0x79d   : > { %v1028_v8 = vmax.f32 %v1026_v6, %v1027_v7 }
 0x79f   : > { %v1029_v9 = vrot.slane %v1028_v8, 1 }
 0x7a1   : > { %v1030_v10 = vmax.f32 %v1028_v8, %v1029_v9 }
 0x7a3   : > { %vm1031_vm15 = vcmp.ge.f32.partialorder %v1018_v63, %v1030_v10  ;;  %vm1032_vm0 = vcmp.ge.f32.partialorder %v1019_v1, %v1030_v10  ;;  %v1474_v1 = vld [vmem:[%s2027_s4 + $0x108] ss:$0 sm:$0xff] }
 0x7a4   : > { %v1033_v11 = vsel %vm1031_vm15, %v1934_v53, 12  ;;  %v1034_v12 = vsel %vm1032_vm0, %v1941_v58, 12 }
 0x7a5   : > { %v1035_v13 = vsel %vm1020_vm13, %v1033_v11, 2147483647  ;;  %v1036_v14 = vsel %vm1022_vm14, %v1034_v12, 2147483647  ;;  %v1262_v11 = vstv %s246_s13 }
 0x7a6   : > { %vm1037_vm1 = vcmp.lt.s32.totalorder %v1035_v13, %v1036_v14  ;;  %vm1264_vm12 = vcmp.lt.s32.totalorder %v1941_v58, %v1262_v11 }
 0x7a7   : > { %v1038_v15 = vsel %vm1037_vm1, %v1035_v13, %v1036_v14 }
 0x7a8   : > { %v1039_v16 = vrot.slane %v1038_v15, 4 }
 0x7aa   : > { %vm1040_vm2 = vcmp.lt.s32.totalorder %v1038_v15, %v1039_v16 }
 0x7ab   : > { %v1041_v17 = vsel %vm1040_vm2, %v1038_v15, %v1039_v16 }
 0x7ac   : > { %v1042_v18 = vrot.slane %v1041_v17, 2 }
 0x7ae   : > { %vm1043_vm3 = vcmp.lt.s32.totalorder %v1041_v17, %v1042_v18 }
 0x7af   : > { %v1044_v19 = vsel %vm1043_vm3, %v1041_v17, %v1042_v18 }
 0x7b0   : > { %v1045_v20 = vrot.slane %v1044_v19, 1 }
 0x7b2   : > { %vm1046_vm4 = vcmp.lt.s32.totalorder %v1044_v19, %v1045_v20 }
 0x7b3   : > { %v1959_v21 = vsel %vm1046_vm4, %v1044_v19, %v1045_v20 }
 0x7b4   : > { %vm1049_vm5 = vcmp.eq.s32.totalorder %v1941_v58, %v1959_v21  ;;  %vm1048_vm6 = vcmp.eq.s32.totalorder %v1934_v53, %v1959_v21  ;;  %vm1266_vm15 = vcmp.ne.s32.totalorder %v1941_v58, %v1959_v21 }
 0x7b5   : > { %v1051_v22 = vsel %vm1049_vm5, 1, %v1735_v50  ;;  %v1050_v23 = vsel %vm1048_vm6, 1, %v1735_v50  ;;  %vm1268_vm1 = vmand %vm1264_vm12, %vm1266_vm15 }
 0x7b6   : > { %1056 = vperm.xlu1 %1704, %v1051_v22   ;;  %1053 = vperm.xlu0 %1703, %v1050_v23  }
 0x835   : > { %v1057_v34 = vpop.permute.xlu1 %1056  ;;  %v1054_v35 = vpop.permute.xlu0 %1053 }
 0x836   : > { %vm1059_vm8 = vcmp.eq.s32.totalorder %v1057_v34, 1  ;;  %vm1058_vm11 = vcmp.eq.s32.totalorder %v1054_v35, 1 }
 0x837   : > { %v1061_v36 = vsel %vm1059_vm8, %v1901_v32, 0.0  ;;  %v1060_v37 = vsel %vm1058_vm11, %v1899_v31, 0.0  ;;  %v1473_v31 = vld [vmem:[%s2027_s4 + $0x100] ss:$0 sm:$0xff]  ;;  %vm1334_vm8 = vcmask 11264   ;;  %vm1349_vm11 = vcmask 8192  }
 0x838   : > { %v1063_v38 = vsel %vm997_vm10, %v1061_v36, 0.0  ;;  %v1062_v39 = vsel %vm463_vm9, %v1060_v37, 0.0 }
 0x839   : > { %v1064_v40 = vadd.f32 %v1063_v38, %v1062_v39 }
 0x83b   : > { %v1065_v41 = vrot.slane %v1064_v40, 4 }
 0x83d   : > { %v1066_v42 = vadd.f32 %v1065_v41, %v1064_v40 }
 0x83f   : > { %v1067_v43 = vrot.slane %v1066_v42, 2 }
 0x841   : > { %v1068_v45 = vadd.f32 %v1067_v43, %v1066_v42 }
 0x843   : > { %v1069_v47 = vrot.slane %v1068_v45, 1 }
 0x845   : > { %v1070_v48 = vadd.f32 %v1069_v47, %v1068_v45 }
 0x847   : > { %1611 = vmatmul.mubr.msk.f32.vlgmr.msra.gmra.mrb[8].mxu0 %vm463_vm9, %v1070_v48 }
 0x91a   : > { %v1148_v50 = vpop.f32.mrb[8].mxu0 }
 0x91b   : > { %v1155_v52 = vrot.slane %v1148_v50, %v1154_v49  ;;  %v1612_v32 = vpop.f32.mrb[9].mxu0 }
 0x91d   : > { %v1223_v55 = vadd.f32 %v1919_v46, %v1155_v52  ;;  %v1228_v56 = vadd.f32 %v1917_v44, %v1155_v52  ;;  %v1336_v44 = vcvt.s32.f32 %v1959_v21  ;;  %v1475_v46 = vld [vmem:[%s2027_s4 + $0x110] ss:$0 sm:$0xff] }
 0x91f   : > { %v1236_v59 = vadd.f32 %v1473_v31, %v1223_v55  ;;  %v1237_v61 = vadd.f32 %v1473_v31, %v1228_v56 }
 0x921   : > { %v1239_v63 = vmax.f32 %v1237_v61, 0.0  ;;  %v1238_v0 = vmax.f32 %v1236_v59, 0.0 }
 0x923   : > { %v1241_v2 = vmin.f32 %v1239_v63, 6.0  ;;  %v1240_v3 = vmin.f32 %v1238_v0, 6.0 }
 0x925   : > { %v1248_v4 = vmul.f32 %v1474_v1, %v1241_v2  ;;  %v1247_v5 = vmul.f32 %v1474_v1, %v1240_v3 }
 0x927   : > { %v1252_v6 = vsel %vm997_vm10, %v1248_v4, 0.0  ;;  %v1249_v7 = vsel %vm463_vm9, %v1247_v5, 0.0  ;;  %vm1263_vm9 = vcmp.lt.s32.totalorder %v1934_v53, %v1262_v11  ;;  %vm1265_vm10 = vcmp.ne.s32.totalorder %v1934_v53, %v1959_v21 }
 0x928   : > { %1253 = vadd.xlane.f32.xlu0 %v1252_v6  ;;  %1250 = vadd.xlane.f32.xlu1 %v1249_v7  ;;  %vm1267_vm0 = vmand %vm1263_vm9, %vm1265_vm10 }
 0x939   : > { %1271 = vrot.lane.b32.xlu1 %v1936_v54, %s1739_s12 }
 0x93d   : > { %1273 = vrot.lane.b32.xlu1 %v1946_v60, %s1739_s12 }
 0x93e   : > { %1317 = vperm.xlu0 %1703, %v1948_v62  }
 0x941   : > { %1312 = vperm.xlu1 %1704, %v1938_v57  }
 0x945   : > { %1340 = vperm.xlu1 %1704, %v1336_v44  }
 0x9b5   : > { %v1251_v8 = vpop.xlane.xlu1 %1250  ;;  %v1254_v10 = vpop.xlane.xlu0 %1253 }
 0x9b6   : > { %v1260_v9 = vadd.f32 %v1475_v46, %v1251_v8  ;;  %v1261_v60 = vadd.f32 %v1475_v46, %v1254_v10 }
 0x9b8   : > { %1322 = vperm.xlu1 %1704, %v1260_v9  }
 0x9b9   : > { %v1272_v54 = vpop.permute.xlu1 %1271 }
 0x9ba   : > { %v1277_v57 = vadd.f32 %v1272_v54, %v1260_v9 }
 0x9bc   : > { %1327 = vperm.xlu1 %1704, %v1261_v60   ;;  %v1279_v12 = vsel %vm1267_vm0, %v1277_v57, -1e+30 }
 0x9bd   : > { %v1274_v62 = vpop.permute.xlu1 %1273  ;;  %v1281_v15 = vsel %vm1020_vm13, %v1279_v12, -inf  ;;  %v1318_v41 = vpop.permute.xlu0 %1317 }
 0x9be   : > { %v1278_v13 = vadd.f32 %v1274_v62, %v1261_v60 }
 0x9c0   : > { %v1280_v14 = vsel %vm1268_vm1, %v1278_v13, -1e+30 }
 0x9c1   : > { %v1282_v16 = vsel %vm1022_vm14, %v1280_v14, -inf }
 0x9c2   : > { %v1283_v17 = vmax.f32 %v1281_v15, %v1282_v16 }
 0x9c4   : > { %v1284_v18 = vrot.slane %v1283_v17, 4 }
 0x9c6   : > { %v1285_v19 = vmax.f32 %v1283_v17, %v1284_v18 }
 0x9c8   : > { %v1286_v20 = vrot.slane %v1285_v19, 2 }
 0x9ca   : > { %v1287_v22 = vmax.f32 %v1285_v19, %v1286_v20 }
 0x9cc   : > { %v1288_v23 = vrot.slane %v1287_v22, 1 }
 0x9ce   : > { %v1289_v24 = vmax.f32 %v1287_v22, %v1288_v23 }
 0x9d0   : > { %vm1290_vm2 = vcmp.ge.f32.partialorder %v1279_v12, %v1289_v24  ;;  %vm1291_vm3 = vcmp.ge.f32.partialorder %v1280_v14, %v1289_v24 }
 0x9d1   : > { %v1292_v21 = vsel %vm1290_vm2, %v1934_v53, 12  ;;  %v1293_v25 = vsel %vm1291_vm3, %v1941_v58, 12  ;;  %v1313_v53 = vpop.permute.xlu1 %1312  ;;  %v1308_v58 = vand.u32 127, %v1008_v51 }
 0x9d2   : > { %v1294_v26 = vsel %vm1020_vm13, %v1292_v21, 2147483647  ;;  %v1295_v27 = vsel %vm1022_vm14, %v1293_v25, 2147483647  ;;  %vm1332_vm14 = vcmask 15360  }
 0x9d3   : > { %vm1296_vm4 = vcmp.lt.s32.totalorder %v1294_v26, %v1295_v27  ;;  %vm1309_vm13 = vcmp.eq.s32.totalorder %v1308_v58, 0 }
 0x9d4   : > { %v1297_v28 = vsel %vm1296_vm4, %v1294_v26, %v1295_v27 }
 0x9d5   : > { %v1298_v29 = vrot.slane %v1297_v28, 4  ;;  %v1341_v38 = vpop.permute.xlu1 %1340 }
 0x9d7   : > { %vm1299_vm5 = vcmp.lt.s32.totalorder %v1297_v28, %v1298_v29 }
 0x9d8   : > { %v1300_v30 = vsel %vm1299_vm5, %v1297_v28, %v1298_v29 }
 0x9d9   : > { %v1301_v33 = vrot.slane %v1300_v30, 2 }
 0x9db   : > { %vm1302_vm6 = vcmp.lt.s32.totalorder %v1300_v30, %v1301_v33 }
 0x9dc   : > { %v1303_v34 = vsel %vm1302_vm6, %v1300_v30, %v1301_v33 }
 0x9dd   : > { %v1304_v35 = vrot.slane %v1303_v34, 1 }
 0x9df   : > { %vm1305_vm7 = vcmp.lt.s32.totalorder %v1303_v34, %v1304_v35 }
 0x9e0   : > { %v1306_v36 = vsel %vm1305_vm7, %v1303_v34, %v1304_v35 }
 0x9e1   : > { %v1337_v37 = vcvt.s32.f32 %v1306_v36 }
 0x9e3   : > { %1345 = vperm.xlu1 %1704, %v1337_v37  }
 0xa37   : > { %v1323_v39 = vpop.permute.xlu1 %1322 }
 0xa38   : > { %v1330_v40 = vsel %vm1309_vm13, %v1313_v53, %v1323_v39 }
 0xa39   : > { %1333 = vst.msk [vmem:[%s244_s17] sm:$0xff] %vm1332_vm14, %v1330_v40 }
 0xa3b   : > { %v1328_v42 = vpop.permute.xlu1 %1327 }
 0xa3c   : > { %v1331_v43 = vsel %vm1309_vm13, %v1318_v41, %v1328_v42 }
 0xa3d   : > { %1335 = vst.msk [vmem:[%s244_s17 + $0x8] sm:$0xf] %vm1334_vm8, %v1331_v43 }
 0xa62   : > { %v1346_v45 = vpop.permute.xlu1 %1345 }
 0xa63   : > { %v1348_v47 = vsel %vm1309_vm13, %v1341_v38, %v1346_v45 }
 0xa64   : > { %1350 = vst.msk [vmem:[%s244_s17 + $0xc] sm:$0x1] %vm1349_vm11, %v1348_v47 }
 0xa65 PF: > { %s21_s23 = sadd.s32 1, %s1731_s23  }
 0xa66   : > { %p18_p9 = scmp.ge.s32.totalorder %s21_s23, 4  }
 0xa68   :  { %20 = sbr.rel (!%p18_p9) target bundleno = 16 (0x10), region = 72 }

</bundles_post_ra>
